<compile_context>
chip_gen: v6e
topology: v6e:2x2x1
jax: 0.10.0
libtpu: 0.0.40
codegen_flags: <defaults>
</compile_context>

<pallas_src>
import functools
import math

import jax
import jax.numpy as jnp
from jax.experimental import pallas as pl
from jax.experimental.pallas import tpu as pltpu


def _round_up(v, m):
    return (v + m - 1) // m * m


def mutual_attention_kernel(x_ref, wfc_ref, wh_ref, bh_ref, out_ref, pooled_acc,
                            *, hw_total, t_hw, chunk, inv_hw, inv_t,
                            k_start, k_num, need_hw_mask):
    hw_idx = pl.program_id(1)

    @pl.when(hw_idx == 0)
    def _init():
        pooled_acc[...] = jnp.zeros_like(pooled_acc)

    n_chunks = t_hw // chunk                    # static
    hw_base = hw_idx * t_hw                     # element offset of this HW tile

    def accum(off):
        # 128-lane chunk add: stays on the 4-wide VPU slot (no per-tile XLU
        # reduce, which could bind on v7x's faster HBM / 2 XLUs).
        xc = x_ref[:, :, pl.ds(off, chunk)].astype(jnp.float32)   # (tB, C, chunk)
        if need_hw_mask:
            pos = jax.lax.broadcasted_iota(jnp.int32, xc.shape, 2) + (hw_base + off)
            xc = jnp.where(pos < hw_total, xc, 0.0)               # tail mask
        pooled_acc[...] += xc

    if n_chunks <= 16:
        for j in range(n_chunks):               # fully static, unrolled
            accum(j * chunk)
    else:
        def body(j, carry):
            accum(pl.multiple_of(j * chunk, chunk))
            return carry
        jax.lax.fori_loop(0, n_chunks, body, 0, unroll=8)

    @pl.when(hw_idx == pl.num_programs(1) - 1)
    def _finalize():
        # single cross-lane reduce per B tile, then AdaptiveAvgPool2d(1) scale
        pooled = jnp.sum(pooled_acc[...], axis=-1) * inv_hw       # (tB, C)
        # fc (1x1 conv, bias=False) + ReLU.
        y = jnp.dot(pooled, wfc_ref[...], preferred_element_type=jnp.float32)
        y = jnp.maximum(y, 0.0)                                   # (tB, attn_pad)
        # Single fused, lane-dense matmul for channel/filter/spatial/kernel heads.
        z = (jnp.dot(y, wh_ref[...], preferred_element_type=jnp.float32)
             + bh_ref[...]) * inv_t                               # (tB, Npad)

        sig = jax.nn.sigmoid(z)
        # Softmax only over the kernel_fc segment (lane mask); sigmoid elsewhere.
        lane = jax.lax.broadcasted_iota(jnp.int32, z.shape, 1)
        in_k = (lane >= k_start) & (lane < k_start + k_num)
        zk = jnp.where(in_k, z, -jnp.inf)
        m = jnp.max(zk, axis=-1, keepdims=True)
        e = jnp.where(in_k, jnp.exp(zk - m), 0.0)
        denom = jnp.sum(e, axis=-1, keepdims=True)
        sm = e / denom                          # exact divide: once per B tile
        res = jnp.where(in_k, sm, sig)
        out_ref[...] = jnp.expand_dims(res, 1).astype(out_ref.dtype)


def kaiming_normal_fan_out_1x1(key, out_c, in_c):
    # PyTorch kaiming_normal_(mode='fan_out', nonlinearity='relu') for a 1x1 conv:
    # fan_out = out_channels * kh * kw = out_channels, std = sqrt(2 / fan_out)
    std = math.sqrt(2.0 / out_c)
    return jax.random.normal(key, (out_c, in_c), jnp.float32) * std


def make_params(key, in_planes, out_planes, kernel_size, kernel_num,
                reduction=0.0625, min_channel=16):
    attn_ch = max(int(in_planes * reduction), min_channel)
    k = jax.random.split(key, 5)
    params = {
        "w_fc": kaiming_normal_fan_out_1x1(k[0], attn_ch, in_planes),       # (attn, Cin)
        "w_ch": kaiming_normal_fan_out_1x1(k[1], in_planes // 2, attn_ch),  # (Cin//2, attn)
        "b_ch": jnp.zeros((in_planes // 2,), jnp.float32),
        "w_f": kaiming_normal_fan_out_1x1(k[2], out_planes, attn_ch),       # (Cout, attn)
        "b_f": jnp.zeros((out_planes,), jnp.float32),
        "w_s": kaiming_normal_fan_out_1x1(k[3], kernel_size * kernel_size, attn_ch),
        "b_s": jnp.zeros((kernel_size * kernel_size,), jnp.float32),
        "w_k": kaiming_normal_fan_out_1x1(k[4], kernel_num, attn_ch),
        "b_k": jnp.zeros((kernel_num,), jnp.float32),
    }
    return params, attn_ch


def pack_params(params):
    """One-time weight packing: transpose to (in, out), fuse the four heads along
    the output (lane) dim and pad to a multiple of 128 so the fused tail matmul
    and the output store are lane-dense.  Call once (constant-folds under jit)."""
    w_fc = params["w_fc"]                                  # (attn, Cin)
    attn, cin = w_fc.shape
    attn_pad = _round_up(attn, 128)
    w_fc_t = jnp.zeros((cin, attn_pad), jnp.float32).at[:, :attn].set(w_fc.T)

    heads = [("w_ch", "b_ch"), ("w_f", "b_f"), ("w_s", "b_s"), ("w_k", "b_k")]
    sizes = tuple(int(params[w].shape[0]) for w, _ in heads)
    n_total = sum(sizes)
    n_pad = _round_up(n_total, 128)
    w_heads = jnp.zeros((attn_pad, n_pad), jnp.float32)
    b_heads = jnp.zeros((1, n_pad), jnp.float32)
    off = 0
    for (wname, bname), n in zip(heads, sizes):
        w_heads = w_heads.at[:attn, off:off + n].set(params[wname].T)
        b_heads = b_heads.at[0, off:off + n].set(params[bname])
        off += n
    return {"w_fc": w_fc_t, "w_heads": w_heads, "b_heads": b_heads,
            "sizes": sizes, "attn_pad": attn_pad, "n_pad": n_pad}


def mutual_attention(x, packed, *, kernel_size, kernel_num, temperature):
    B, C, H, W = x.shape
    HW = H * W
    n_ch, n_f, n_s, n_k = packed["sizes"]
    assert n_s == kernel_size * kernel_size and n_k == kernel_num
    n_pad = packed["n_pad"]
    attn_pad = packed["attn_pad"]
    k_start = n_ch + n_f + n_s

    # ---- tiling ------------------------------------------------------------
    itemsize = jnp.dtype(x.dtype).itemsize
    budget = 8 * 1024 * 1024                 # target bytes per input buffer

    # tB is a LEADING block dim (output is (B, 1, Npad)), so it has no (8,128)
    # constraint.  Keep >=2 B blocks whenever B >= 2 (v7x megacore), cap at 8.
    tB = max(1, min(8, (B + 1) // 2))
    # Huge-C guard: even the minimum 128-lane tile must not blow the budget.
    while tB > 1 and tB * C * 128 * itemsize > budget:
        tB = max(1, tB // 2)

    lanes = budget // max(1, tB * C * itemsize)
    lanes = max(128, (lanes // 128) * 128)
    if HW >= 128:
        tHW = int(min(lanes, (HW // 128) * 128))   # multiple of 128, <= HW
        chunk = 128
    else:
        tHW = HW                                   # full (tiny) spatial extent
        chunk = HW
    grid = (pl.cdiv(B, tB), pl.cdiv(HW, tHW))
    need_hw_mask = (HW % tHW) != 0                 # partial last HW tile

    x_flat = x.reshape(B, C, HW)                   # no pad -> no extra HBM copy

    kernel = functools.partial(
        mutual_attention_kernel,
        hw_total=HW, t_hw=tHW, chunk=chunk,
        inv_hw=1.0 / float(HW),                    # AdaptiveAvgPool2d(1)
        inv_t=1.0 / float(temperature),
        k_start=k_start, k_num=n_k, need_hw_mask=need_hw_mask)

    # Explicit scoped-VMEM limit: double-buffered x tiles + weights + scratch,
    # capped at 48 MiB so it also fits v7x's 64 MiB physical VMEM.
    w_bytes = 4 * (packed["w_fc"].size + packed["w_heads"].size
                   + packed["b_heads"].size)
    vmem_est = (2 * tB * C * tHW * itemsize
                + 2 * w_bytes
                + tB * C * 128 * 4
                + 2 * tB * n_pad * 4)
    vmem_limit = int(min(48 * 1024 * 1024,
                         max(vmem_est + 4 * 1024 * 1024, 16 * 1024 * 1024)))

    cost = pl.CostEstimate(
        flops=int(B * C * HW + 2 * B * (C * attn_pad + attn_pad * n_pad)),
        transcendentals=int(2 * B * n_pad),
        bytes_accessed=int(B * C * HW * itemsize + w_bytes + B * n_pad * 4))

    slab = pl.pallas_call(
        kernel,
        out_shape=jax.ShapeDtypeStruct((B, 1, n_pad), jnp.float32),
        grid=grid,
        in_specs=[
            pl.BlockSpec((tB, C, tHW), lambda b, h: (b, 0, h)),
            pl.BlockSpec((C, attn_pad), lambda b, h: (0, 0)),
            pl.BlockSpec((attn_pad, n_pad), lambda b, h: (0, 0)),
            pl.BlockSpec((1, n_pad), lambda b, h: (0, 0)),
        ],
        out_specs=pl.BlockSpec((tB, 1, n_pad), lambda b, h: (b, 0, 0)),
        scratch_shapes=[pltpu.VMEM((tB, C, chunk if chunk < 128 else 128),
                                   jnp.float32)],
        compiler_params=pltpu.CompilerParams(
            dimension_semantics=("parallel", "arbitrary"),
            vmem_limit_bytes=vmem_limit),
        cost_estimate=cost,
    )(x_flat, packed["w_fc"], packed["w_heads"], packed["b_heads"])

    # Split the fused lane-dense slab back into the PyTorch output shapes.
    slab = slab.reshape(B, n_pad)
    channel_attention = slab[:, :n_ch].reshape(B, -1, 1, 1)
    filter_attention = slab[:, n_ch:n_ch + n_f].reshape(B, -1, 1, 1)
    spatial_attention = slab[:, n_ch + n_f:k_start].reshape(
        B, 1, 1, 1, kernel_size, kernel_size)
    kernel_attention = slab[:, k_start:k_start + n_k].reshape(B, -1, 1, 1, 1, 1)
    return channel_attention, filter_attention, spatial_attention, kernel_attention


def mutual_attention_ref(x, params, *, kernel_size, kernel_num, temperature):
    # pure-JAX reference for sanity checking
    B = x.shape[0]
    pooled = jnp.mean(x.astype(jnp.float32), axis=(2, 3))
    y = jnp.maximum(pooled @ params["w_fc"].T, 0.0)
    T = float(temperature)
    ch = jax.nn.sigmoid((y @ params["w_ch"].T + params["b_ch"]) / T)
    fl = jax.nn.sigmoid((y @ params["w_f"].T + params["b_f"]) / T)
    sp = jax.nn.sigmoid((y @ params["w_s"].T + params["b_s"]) / T)
    kn = jax.nn.softmax((y @ params["w_k"].T + params["b_k"]) / T, axis=-1)
    return (ch.reshape(B, -1, 1, 1), fl.reshape(B, -1, 1, 1),
            sp.reshape(B, 1, 1, 1, kernel_size, kernel_size),
            kn.reshape(B, -1, 1, 1, 1, 1))


if __name__ == "__main__":
    # small, module-consistent shapes
    B, in_planes, out_planes, H, W = 2, 16, 16, 16, 16
    kernel_size, kernel_num, temperature = 3, 4, 34

    key = jax.random.PRNGKey(0)
    kx, kp = jax.random.split(key)
    x = jax.random.normal(kx, (B, in_planes, H, W), jnp.float32)
    params, attn_ch = make_params(kp, in_planes, out_planes, kernel_size, kernel_num)
    packed = pack_params(params)   # one-time weight packing (outside per-call path)

    outs = mutual_attention(x, packed, kernel_size=kernel_size,
                            kernel_num=kernel_num, temperature=temperature)
    outs = jax.block_until_ready(outs)

    refs = mutual_attention_ref(x, params, kernel_size=kernel_size,
                                kernel_num=kernel_num, temperature=temperature)
    # tolerance covers MXU default-precision f32 matmuls (softmax now uses an
    # exact divide, so no approx-reciprocal slack is needed)
    for o, r in zip(outs, refs):
        assert o.shape == r.shape, (o.shape, r.shape)
        assert jnp.allclose(o, r, atol=1e-3, rtol=1e-3), float(jnp.max(jnp.abs(o - r)))

    print("KERNEL_OK")
</pallas_src>

<mosaic_0001>
module attributes {stable_mosaic.version = 11 : i64} {
  func.func @mutual_attention_kernel(%arg0: i32, %arg1: i32, %arg2: memref<1x16x256xf32, #tpu.memory_space<vmem>>, %arg3: memref<16x128xf32, #tpu.memory_space<vmem>>, %arg4: memref<128x128xf32, #tpu.memory_space<vmem>>, %arg5: memref<1x128xf32, #tpu.memory_space<vmem>>, %arg6: memref<1x1x128xf32, #tpu.memory_space<vmem>>, %arg7: memref<1x16x128xf32, #tpu.memory_space<vmem>>) attributes {dimension_semantics = [#tpu.dimension_semantics<parallel>, #tpu.dimension_semantics<arbitrary>], iteration_bounds = array<i64: 2, 1>, scalar_prefetch = 0 : i64, scratch_operands = 1 : i64, tpu.core_type = #tpu.core_type<tc>, window_params = [{transform_indices = @transform_0, window_bounds = array<i64: 1, 16, 256>}, {pipeline_mode = #tpu.pipeline_mode<synchronous>, transform_indices = @transform_1, window_bounds = array<i64: 16, 128>}, {pipeline_mode = #tpu.pipeline_mode<synchronous>, transform_indices = @transform_2, window_bounds = array<i64: 128, 128>}, {pipeline_mode = #tpu.pipeline_mode<synchronous>, transform_indices = @transform_3, window_bounds = array<i64: 1, 128>}, {transform_indices = @transform_4, window_bounds = array<i64: 1, 1, 128>}]} {
    %c0_i32 = arith.constant 0 : i32
    %0 = arith.cmpi eq, %arg1, %c0_i32 : i32
    %1 = arith.extui %0 : i1 to i32
    %c0_i32_0 = arith.constant 0 : i32
    %2 = arith.cmpi ne, %1, %c0_i32_0 : i32
    scf.if %2 {
      %cst = arith.constant 0.000000e+00 : f32
      %14 = vector.broadcast %cst : f32 to vector<1x16x128xf32>
      %c0_19 = arith.constant 0 : index
      %c0_20 = arith.constant 0 : index
      %c0_21 = arith.constant 0 : index
      %15 = vector.load %arg7[%c0_19, %c0_20, %c0_21] : memref<1x16x128xf32, #tpu.memory_space<vmem>>, vector<1x16x128xf32>
      tpu.vector_store %arg7[%c0_19, %c0_20, %c0_21], %14 {strides = array<i32>} : memref<1x16x128xf32, #tpu.memory_space<vmem>>, vector<1x16x128xf32>,
    } else {
    }
    %c0 = arith.constant 0 : index
    %c0_1 = arith.constant 0 : index
    %c0_2 = arith.constant 0 : index
    %3 = vector.load %arg2[%c0, %c0_1, %c0_2] : memref<1x16x256xf32, #tpu.memory_space<vmem>>, vector<1x16x128xf32>
    %c0_3 = arith.constant 0 : index
    %c0_4 = arith.constant 0 : index
    %c0_5 = arith.constant 0 : index
    %4 = vector.load %arg7[%c0_3, %c0_4, %c0_5] : memref<1x16x128xf32, #tpu.memory_space<vmem>>, vector<1x16x128xf32>
    %5 = arith.addf %4, %3 : vector<1x16x128xf32>
    %c0_6 = arith.constant 0 : index
    %c0_7 = arith.constant 0 : index
    %c0_8 = arith.constant 0 : index
    %6 = vector.load %arg7[%c0_6, %c0_7, %c0_8] : memref<1x16x128xf32, #tpu.memory_space<vmem>>, vector<1x16x128xf32>
    tpu.vector_store %arg7[%c0_6, %c0_7, %c0_8], %5 {strides = array<i32>} : memref<1x16x128xf32, #tpu.memory_space<vmem>>, vector<1x16x128xf32>,
    %c0_9 = arith.constant 0 : index
    %c0_10 = arith.constant 0 : index
    %c128 = arith.constant 128 : index
    %7 = vector.load %arg2[%c0_9, %c0_10, %c128] : memref<1x16x256xf32, #tpu.memory_space<vmem>>, vector<1x16x128xf32>
    %c0_11 = arith.constant 0 : index
    %c0_12 = arith.constant 0 : index
    %c0_13 = arith.constant 0 : index
    %8 = vector.load %arg7[%c0_11, %c0_12, %c0_13] : memref<1x16x128xf32, #tpu.memory_space<vmem>>, vector<1x16x128xf32>
    %9 = arith.addf %8, %7 : vector<1x16x128xf32>
    %c0_14 = arith.constant 0 : index
    %c0_15 = arith.constant 0 : index
    %c0_16 = arith.constant 0 : index
    %10 = vector.load %arg7[%c0_14, %c0_15, %c0_16] : memref<1x16x128xf32, #tpu.memory_space<vmem>>, vector<1x16x128xf32>
    tpu.vector_store %arg7[%c0_14, %c0_15, %c0_16], %9 {strides = array<i32>} : memref<1x16x128xf32, #tpu.memory_space<vmem>>, vector<1x16x128xf32>,
    %c0_i32_17 = arith.constant 0 : i32
    %11 = arith.cmpi eq, %arg1, %c0_i32_17 : i32
    %12 = arith.extui %11 : i1 to i32
    %c0_i32_18 = arith.constant 0 : i32
    %13 = arith.cmpi ne, %12, %c0_i32_18 : i32
    scf.if %13 {
      %c0_19 = arith.constant 0 : index
      %c0_20 = arith.constant 0 : index
      %c0_21 = arith.constant 0 : index
      %14 = vector.load %arg7[%c0_19, %c0_20, %c0_21] : memref<1x16x128xf32, #tpu.memory_space<vmem>>, vector<1x16x128xf32>
      %cst = arith.constant dense<0.000000e+00> : vector<1x16xf32>
      %15 = vector.multi_reduction <add>, %14, %cst [2] : vector<1x16x128xf32> to vector<1x16xf32>
      %cst_22 = arith.constant 3.906250e-03 : f32
      %16 = vector.broadcast %cst_22 : f32 to vector<1x16xf32>
      %17 = arith.mulf %15, %16 : vector<1x16xf32>
      %c0_23 = arith.constant 0 : index
      %c0_24 = arith.constant 0 : index
      %18 = vector.load %arg3[%c0_23, %c0_24] : memref<16x128xf32, #tpu.memory_space<vmem>>, vector<16x128xf32>
      %cst_25 = arith.constant dense<0.000000e+00> : vector<1x128xf32>
      %19 = tpu.matmul %17, %18, %cst_25 {dimension_numbers = #tpu.dot_dimension_numbers<[1], [0], [0], [1], [0, 0, 1, 1], [], []>} : vector<1x16xf32>, vector<16x128xf32>, vector<1x128xf32> -> vector<1x128xf32>
      %cst_26 = arith.constant 0.000000e+00 : f32
      %20 = vector.broadcast %cst_26 : f32 to vector<1x128xf32>
      %21 = arith.maximumf %19, %20 : vector<1x128xf32>
      %c0_27 = arith.constant 0 : index
      %c0_28 = arith.constant 0 : index
      %22 = vector.load %arg4[%c0_27, %c0_28] : memref<128x128xf32, #tpu.memory_space<vmem>>, vector<128x128xf32>
      %cst_29 = arith.constant dense<0.000000e+00> : vector<1x128xf32>
      %23 = tpu.matmul %21, %22, %cst_29 {dimension_numbers = #tpu.dot_dimension_numbers<[1], [0], [0], [1], [0, 0, 1, 1], [], []>} : vector<1x128xf32>, vector<128x128xf32>, vector<1x128xf32> -> vector<1x128xf32>
      %c0_30 = arith.constant 0 : index
      %c0_31 = arith.constant 0 : index
      %24 = vector.load %arg5[%c0_30, %c0_31] : memref<1x128xf32, #tpu.memory_space<vmem>>, vector<1x128xf32>
      %25 = arith.addf %23, %24 : vector<1x128xf32>
      %cst_32 = arith.constant 0.0294117648 : f32
      %26 = vector.broadcast %cst_32 : f32 to vector<1x128xf32>
      %27 = arith.mulf %25, %26 : vector<1x128xf32>
      %28 = arith.negf %27 : vector<1x128xf32>
      %29 = math.exp %28 : vector<1x128xf32>
      %cst_33 = arith.constant 1.000000e+00 : f32
      %30 = vector.broadcast %cst_33 : f32 to vector<1x128xf32>
      %31 = arith.addf %30, %29 : vector<1x128xf32>
      %32 = arith.divf %30, %31 : vector<1x128xf32>
      %33 = tpu.iota {dimensions = array<i32: 1>} : vector<1x128xi32>
      %c33_i32 = arith.constant 33 : i32
      %34 = vector.broadcast %c33_i32 : i32 to vector<1x128xi32>
      %35 = arith.cmpi sge, %33, %34 : vector<1x128xi32>
      %c37_i32 = arith.constant 37 : i32
      %36 = vector.broadcast %c37_i32 : i32 to vector<1x128xi32>
      %37 = arith.cmpi slt, %33, %36 : vector<1x128xi32>
      %38 = arith.andi %35, %37 : vector<1x128xi1>
      %cst_34 = arith.constant 0xFF800000 : f32
      %39 = vector.broadcast %cst_34 : f32 to vector<1x128xf32>
      %40 = arith.select %38, %27, %39 : vector<1x128xi1>, vector<1x128xf32>
      %cst_35 = arith.constant dense<0xFF800000> : vector<1xf32>
      %41 = vector.multi_reduction <maximumf>, %40, %cst_35 [1] : vector<1x128xf32> to vector<1xf32>
      %42 = vector.shape_cast %41 : vector<1xf32> to vector<1x1xf32>
      %43 = vector.broadcast %42 : vector<1x1xf32> to vector<1x128xf32>
      %44 = arith.subf %40, %43 : vector<1x128xf32>
      %45 = math.exp %44 : vector<1x128xf32>
      %cst_36 = arith.constant 0.000000e+00 : f32
      %46 = vector.broadcast %cst_36 : f32 to vector<1x128xf32>
      %47 = arith.select %38, %45, %46 : vector<1x128xi1>, vector<1x128xf32>
      %cst_37 = arith.constant dense<0.000000e+00> : vector<1xf32>
      %48 = vector.multi_reduction <add>, %47, %cst_37 [1] : vector<1x128xf32> to vector<1xf32>
      %49 = vector.shape_cast %48 : vector<1xf32> to vector<1x1xf32>
      %50 = vector.broadcast %49 : vector<1x1xf32> to vector<1x128xf32>
      %51 = arith.divf %47, %50 : vector<1x128xf32>
      %52 = arith.select %38, %51, %32 : vector<1x128xi1>, vector<1x128xf32>
      %53 = vector.shape_cast %52 : vector<1x128xf32> to vector<1x1x128xf32>
      %c0_38 = arith.constant 0 : index
      %c0_39 = arith.constant 0 : index
      %c0_40 = arith.constant 0 : index
      %54 = vector.load %arg6[%c0_38, %c0_39, %c0_40] : memref<1x1x128xf32, #tpu.memory_space<vmem>>, vector<1x1x128xf32>
      tpu.vector_store %arg6[%c0_38, %c0_39, %c0_40], %53 {strides = array<i32>} : memref<1x1x128xf32, #tpu.memory_space<vmem>>, vector<1x1x128xf32>,
    } else {
    }
    return
  }
  func.func @transform_0(%arg0: i32, %arg1: i32) -> (i32, i32, i32) {
    %c0_i32 = arith.constant 0 : i32
    %c0_i32_0 = arith.constant 0 : i32
    return %arg0, %c0_i32, %arg1 : i32, i32, i32
  }
  func.func @transform_1(%arg0: i32, %arg1: i32) -> (i32, i32) {
    %c0_i32 = arith.constant 0 : i32
    %c0_i32_0 = arith.constant 0 : i32
    %c0_i32_1 = arith.constant 0 : i32
    return %c0_i32, %c0_i32_0 : i32, i32
  }
  func.func @transform_2(%arg0: i32, %arg1: i32) -> (i32, i32) {
    %c0_i32 = arith.constant 0 : i32
    %c0_i32_0 = arith.constant 0 : i32
    %c0_i32_1 = arith.constant 0 : i32
    return %c0_i32, %c0_i32_0 : i32, i32
  }
  func.func @transform_3(%arg0: i32, %arg1: i32) -> (i32, i32) {
    %c0_i32 = arith.constant 0 : i32
    %c0_i32_0 = arith.constant 0 : i32
    %c0_i32_1 = arith.constant 0 : i32
    return %c0_i32, %c0_i32_0 : i32, i32
  }
  func.func @transform_4(%arg0: i32, %arg1: i32) -> (i32, i32, i32) {
    %c0_i32 = arith.constant 0 : i32
    %c0_i32_0 = arith.constant 0 : i32
    %c0_i32_1 = arith.constant 0 : i32
    return %arg0, %c0_i32, %c0_i32_0 : i32, i32, i32
  }
}

</mosaic_0001>

<bundles_post_ra>
// kernel: tpu_custom_call.1
= control target key start
LH: loop header
LB: loop body
LE: loop exit
PB: predicated region body
PF: predicated region fallthrough
CT: control target
= control target key end

     0   :  { %9 = vsyncpa [#allocation4], 0  ;;  %s1200_s0 = inlined_call_operand.hbm [shape: f32[2,16,256], index: 0, kind: input, shape index: {}]   ;;  %s1201_s1 = inlined_call_operand.hbm [shape: f32[16,128], index: 1, kind: input, shape index: {}]   ;;  %s1202_s2 = inlined_call_operand.hbm [shape: f32[128,128], index: 2, kind: input, shape index: {}]   ;;  %s1203_s3 = inlined_call_operand.vmem [shape: f32[1,128], index: 3, kind: input, shape index: {}]   ;;  %s1204_s4 = inlined_call_operand.hbm [shape: f32[2,1,128], index: 4, kind: output, shape index: {}]  }
   0x1   :  { %11 = vsyncpa [#allocation4 + $0x1], 0 }
   0x2   :  { %12 = vsyncpa [#allocation7], 0 }
   0x3   :  { %13 = vsyncpa [#allocation5], 0 }
   0x4   :  { %15 = vsyncpa [#allocation5 + $0x1], 0  ;;  %s986_s15 = smov 0   ;;  %s988_s16 = smov 0  }
   0x5   :  { %s990_s17 = smov 0   ;;  %s992_s18 = smov 0  }
   0x6   :  { %s994_s19 = smov 0   ;;  %s996_s20 = smov 0  }
   0x7 LB: > { %s607_s21 = sadd.s32 4294967295, %s949_s20   ;;  %s608_s22 = sadd.s32 4294967294, %s949_s20   ;;  %s949_s20 = sphi %s996_s20, %s21_s20   ;;  %s945_s19 = sphi %s994_s19, %s1226_s19   ;;  %s941_s18 = sphi %s992_s18, %s1225_s18   ;;  %s937_s17 = sphi %s990_s17, %s1224_s17   ;;  %s933_s16 = sphi %s988_s16, %s1223_s16   ;;  %s929_s15 = sphi %s986_s15, %s1222_s15  }
   0x8   : > { %p55_p0 = scmp.ne.s32.totalorder %s933_s16, %s929_s15  ;;  %p1020_p1 = scmp.eq.s32.totalorder %s607_s21, 0 }
   0x9   : > { %p1024_p2 = scmp.eq.s32.totalorder %s607_s21, 1  ;;  %p148_p3 = scmp.eq.s32.totalorder %s608_s22, 1 }
   0xa   : > { %s1208_s23 = scalar_select %p1020_p1, 1, 0 }
   0xb   : > { %p1030_p4 = por %p1020_p1, %p55_p0  ;;  %p609_p5 = scmp.ge.s32.totalorder %s949_s20, 1 }
   0xc   : > { %p1035_p6 = por %p148_p3, %p55_p0  ;;  %p155_p7 = scmp.lt.s32.totalorder %s949_s20, 3 }
   0xd   : > { %s1210_s25 = scalar_select %p1030_p4, 1, 0 }
   0xe   : > { %s1211_s26 = scalar_select %p1035_p6, 1, 0 }
   0xf   : > { %p1040_p8 = pnand %p609_p5, %p155_p7  ;;  %s951_s28 = smov [#allocation6]  }
  0x10   : > { %s167_s29 = sshll.u32 %s951_s28, 4  ;;  %s952_s5 = smov [#allocation8]   ;;  %s168_s29 = int_to_ptr.vmem [resolvable:$true] %s167_s29 }
  0x11   : > { %p700_p9 = pneg %p1040_p8  ;;  %s180_s6 = sshll.u32 %s952_s5, 4  ;;  %s181_s6 = int_to_ptr.vmem [resolvable:$true] %s180_s6 }
  0x12   : > { %s796_s7 = scalar_lea.vmem %s168_s29, 256  ;;  %p804_p5 = scmp.lt.s32.totalorder %s168_s29, %s168_s29 }
  0x13   : > { %p1049_p11 = pnand %p700_p9, %p1020_p1  ;;  %p797_p13 = scmp.ne.s32.totalorder %s168_s29, %s796_s7 }
  0x14   : > { %p805_p7 = scmp.lt.s32.totalorder %s796_s7, %s796_s7 }
  0x15   : > { %p787_p12 = pneg %p1049_p11 }
  0x16   : > { %p806_p10 = por %p805_p7, %p804_p5 }
  0x17   : > { %p799_p0 = pnand %p797_p13, %p787_p12 }
  0x19   : > { %p800_p3 = pneg %p799_p0 }
  0x1b   : > { %p807_p9 = pnand %p806_p10, %p800_p3 }
  0x1d   : > { %810 = shalt.err (!%p807_p9)
}
  0x1e   : > { %s953_s8 = smov 128   ;;  %s954_s9 = smov 8  }
  0x1f   : > { %703 = dma.hbm_to_vmem [thread:$0]  (!%p1049_p11), %s1201_s1, 256, %s168_s29, [#allocation7], %s953_s8, %s953_s8, %s954_s9  }
  0x20   : > { %s822_s12 = scalar_lea.vmem %s181_s6, 2048  ;;  %p830_p1 = scmp.lt.s32.totalorder %s181_s6, %s181_s6 }
  0x21   : > { %p823_p6 = scmp.ne.s32.totalorder %s181_s6, %s822_s12  ;;  %p831_p4 = scmp.lt.s32.totalorder %s822_s12, %s822_s12 }
  0x23   : > { %p825_p13 = pnand %p823_p6, %p787_p12  ;;  %p832_p5 = por %p831_p4, %p830_p1 }
  0x25   : > { %p826_p0 = pneg %p825_p13 }
  0x27   : > { %p833_p10 = pnand %p832_p5, %p826_p0 }
  0x29   : > { %836 = shalt.err (!%p833_p10)
}
  0x2a   : > { %706 = dma.hbm_to_vmem [thread:$0]  (!%p1049_p11), %s1202_s2, 2048, %s181_s6, [#allocation7], %s953_s8, %s953_s8, %s954_s9  }
  0x2b   : > { %s33_s21 = sadd.s32 1, %s945_s19  ;;  %s42_s22 = sadd.s32 1, %s937_s17 }
  0x2c   : > { %p35_p1 = scmp.ge.s32.totalorder %s33_s21, 2  ;;  %p49_p4 = scmp.ne.s32.totalorder %s937_s17, %s933_s16 }
  0x2d   : > { %p50_p6 = scmp.eq.s32.totalorder %s949_s20, 0  ;;  %p717_p12 = scmp.lt.s32.totalorder %s949_s20, 2 }
  0x2e   : > { %s1228_s21 = smov (%p35_p1, %s33_s21), 0  ;;  %p1081_p7 = por %p1024_p2, %p49_p4 }
  0x2f   : > { %p51_p3 = por %p50_p6, %p49_p4  ;;  %s37_s29 = ssub.s32 %s945_s19, %s1228_s21 }
  0x30   : > { %s197_s30 = sand.u32 1, %s937_s17   ;;  %p40_p9 = scmp.eq.s32.totalorder %s37_s29, 0 }
  0x31   : > { %s613_s5 = sshll.u32 %s197_s30, 5  ;;  %s625_s6 = sshll.u32 %s945_s19, 9 }
  0x32   : > { %s1090_s7 = scalar_select %p40_p9, %s937_s17, %s42_s22  }
  0x33   : > { %s209_s10 = scalar_lea.hbm %s1200_s0, %s625_s6  ;;  %s201_s11 = scalar_lea.vmem [#allocation3], %s613_s5 }
  0x34   : > { %s210_s12 = sshll.u32 %s201_s11, 4  ;;  %p1097_p11 = pnand %p717_p12, %p51_p3  ;;  %s211_s12 = int_to_ptr.vmem [resolvable:$true] %s210_s12 }
  0x35   : > { %s198_s13 = scalar_lea.sflag [#allocation4], %s197_s30  ;;  %s850_s14 = scalar_lea.vmem %s211_s12, 512 }
  0x36   : > { %p839_p2 = pneg %p1097_p11  ;;  %p851_p13 = scmp.ne.s32.totalorder %s211_s12, %s850_s14 }
  0x37   : > { %s955_s22 = smov [#allocation3]  }
  0x38   : > { %p853_p0 = pnand %p851_p13, %p839_p2  ;;  %s855_s29 = sshll.u32 %s955_s22, 4  ;;  %s856_s29 = int_to_ptr.vmem [resolvable:$false] %s855_s29 }
  0x39   : > { %s857_s6 = scalar_lea.vmem %s856_s29, 1024  ;;  %p858_p10 = scmp.lt.s32.totalorder %s211_s12, %s856_s29 }
  0x3a   : > { %p854_p5 = pneg %p853_p0  ;;  %p859_p1 = scmp.lt.s32.totalorder %s857_s6, %s850_s14 }
  0x3c   : > { %p860_p4 = por %p859_p1, %p858_p10 }
  0x3e   : > { %p861_p6 = pnand %p860_p4, %p854_p5 }
  0x40   : > { %864 = shalt.err (!%p861_p6)
}
  0x41   : > { %s956_s5 = smov 256   ;;  %s957_s8 = smov 16  }
  0x42   : > { %710 = dma.hbm_to_vmem [thread:$0]  (!%p1097_p11), %s209_s10, 512, %s211_s12, %s198_s13, %s956_s5, %s956_s5, %s957_s8  }
  0x43   : > { %222 = sbr.rel (%p1040_p8) target bundleno = 946 (0x3b2), region = 36  ;;  %s1108_s30 = sand.u32 (!%p1040_p8), 1, %s933_s16  }
  0x44   : > { %s617_s9 = sshll.u32 (!%p1040_p8), %s1108_s30, 5  ;;  %s225_s11 = scalar_lea.sflag (!%p1040_p8), [#allocation4], %s1108_s30 }
  0x45   : > { %s228_s14 = scalar_lea.vmem (!%p1040_p8), [#allocation3], %s617_s9  ;;  %p1216_p12 = scmp.ne.s32.totalorder (!%p1040_p8), %s1210_s25, 0 }
  0x48   : > { %916 = dma.done.wait (%p1216_p12), %s225_s11, 512  }
  0x49   : > { %918 = vsyncadd (%p1216_p12), %s225_s11, 4294966784  ;;  %p1217_p3 = scmp.ne.s32.totalorder %s1208_s23, 0 }
  0x4b   : > { %920 = dma.done.wait (%p1217_p3), [#allocation7], 2304  }
  0x4c   : > { %922 = vsyncadd (%p1217_p3), [#allocation7], 4294964992  ;;  %v267_v0 = vld [vmem:[%s228_s14] sm:$0xff]  ;;  %v275_v1 = vld [vmem:[%s228_s14 + $0x8] sm:$0xff]  ;;  %v958_v6 = vmov 0.0   ;;  %vm959_vm0 = vmmov 0   ;;  %v298_v23 = vlaneseq }
  0x4d   : > { %v268_v2 = vld [vmem:[%s228_s14 + $0x10] sm:$0xff]  ;;  %v279_v3 = vadd.f32 %v275_v1, %v267_v0  ;;  %v276_v4 = vld [vmem:[%s228_s14 + $0x18] sm:$0xff]  ;;  %646 = vmatprep.subr.mxu0 %v958_v6  ;;  %v295_v7 = vld [vmem:[#allocation6 + $0x8] sm:$0xff]  ;;  %653 = vmatprep.subr.mxu1 %v958_v6  ;;  %vm309_vm1 = vcmask 130112   ;;  %vm311_vm2 = vcmask 130048   ;;  %vm483_vm6 = vcmask 1040384  }
  0x4e   : > { %v280_v5 = vadd.f32 %v276_v4, %v268_v2  ;;  %647 = vmatpush3.msra.mxu0 %v295_v7  ;;  %v294_v8 = vld [vmem:[#allocation6] sm:$0xff]  ;;  %650 = vmatprep.mubr.msk.f32.mxu0 %vm959_vm0, %v958_v6  ;;  %v400_v9 = vld [vmem:[#allocation8 + $0x78] sm:$0xff]  ;;  %v398_v11 = vld [vmem:[#allocation8 + $0x68] sm:$0xff]  ;;  %v299_v24 = vand.u32 127, %v298_v23  ;;  %v301_v25 = vshrl.u32 %v298_v23, 7  ;;  %s622_s27 = sshll.u32 %s941_s18, 4 }
  0x4f   : > { %288 = vadd.xlane.f32.xlu0 %v279_v3  ;;  %648 = vmatprep.subr.mxu0 %v958_v6  ;;  %v399_v10 = vld [vmem:[#allocation8 + $0x70] sm:$0xff]  ;;  %v397_v12 = vld [vmem:[#allocation8 + $0x60] sm:$0xff]  ;;  %v396_v13 = vld [vmem:[#allocation8 + $0x58] sm:$0xff]  ;;  %s259_s10 = scalar_lea.vmem [#allocation9], %s1108_s30  ;;  %s1156_s22 = scalar_lea.hbm %s1204_s4, %s622_s27 }
  0x50   : > { %649 = vmatpush3.msra.mxu0 %v294_v8  ;;  %685 = vmatprep.mubr.msk.f32.mxu1 %vm959_vm0, %v958_v6  ;;  %v395_v14 = vld [vmem:[#allocation8 + $0x50] sm:$0xff]  ;;  %v394_v15 = vld [vmem:[#allocation8 + $0x48] sm:$0xff]  ;;  %v393_v16 = vld [vmem:[#allocation8 + $0x40] sm:$0xff]  ;;  %v304_v26 = vadd.s32 4294967288, %v299_v24  ;;  %v302_v28 = vsub.s32 %v299_v24, %v301_v25  ;;  %vm479_vm3 = vcmp.ge.s32.totalorder %v299_v24, 33  ;;  %vm480_vm4 = vcmp.lt.s32.totalorder %v299_v24, 37 }
  0x51   : > { %654 = vmatpush3.msra.mxu1 %v400_v9  ;;  %v392_v17 = vld [vmem:[#allocation8 + $0x38] sm:$0xff]  ;;  %v391_v18 = vld [vmem:[#allocation8 + $0x30] sm:$0xff]  ;;  %v390_v19 = vld [vmem:[#allocation8 + $0x28] sm:$0xff]  ;;  %s511_s12 = sshll.u32 %s259_s10, 4  ;;  %s499_s29 = scalar_lea.sflag [#allocation5], %s1108_s30  ;;  %s512_s12 = int_to_ptr.vmem [resolvable:$true] %s511_s12 }
  0x52   : > { %655 = vmatprep.subr.mxu1 %v958_v6  ;;  %v389_v20 = vld [vmem:[#allocation8 + $0x20] sm:$0xff]  ;;  %v388_v21 = vld [vmem:[#allocation8 + $0x18] sm:$0xff]  ;;  %v387_v22 = vld [vmem:[#allocation8 + $0x10] sm:$0xff]  ;;  %v307_v30 = vsub.s32 %v304_v26, %v301_v25  ;;  %s865_s6 = scalar_lea.vmem %s512_s12, 16  ;;  %s960_s18 = smov [#allocation9]  }
  0x53   : > { %290 = vadd.xlane.f32.xlu0 %v280_v5  ;;  %656 = vmatpush3.msra.mxu1 %v399_v10  ;;  %v386_v36 = vld [vmem:[#allocation8 + $0x8] sm:$0xff]  ;;  %v385_v37 = vld [vmem:[#allocation8] sm:$0xff]  ;;  %v401_v41 = vld [vmem:[%s1203_s3] sm:$0x1]  ;;  %p866_p8 = scmp.ne.s32.totalorder %s512_s12, %s865_s6  ;;  %s869_s5 = sshll.u32 %s960_s18, 4  ;;  %s870_s5 = int_to_ptr.vmem [resolvable:$false] %s869_s5 }
  0x54   : > { %657 = vmatprep.subr.mxu1 %v958_v6  ;;  %vm1143_vm5 = vmand %vm479_vm3, %vm480_vm4  ;;  %s871_s8 = scalar_lea.vmem %s870_s5, 32  ;;  %p872_p2 = scmp.lt.s32.totalorder %s512_s12, %s870_s5 }
  0x55   : > { %658 = vmatpush3.msra.mxu1 %v398_v11  ;;  %p867_p9 = pnand %p866_p8, %p1081_p7  ;;  %p873_p13 = scmp.lt.s32.totalorder %s871_s8, %s865_s6 }
  0x56   : > { %659 = vmatprep.subr.mxu1 %v958_v6 }
  0x57   : > { %660 = vmatpush3.msra.mxu1 %v397_v12  ;;  %p868_p11 = pneg %p867_p9  ;;  %p874_p0 = por %p873_p13, %p872_p2 }
  0x58   : > { %661 = vmatprep.subr.mxu1 %v958_v6 }
  0x59   : > { %662 = vmatpush3.msra.mxu1 %v396_v13  ;;  %p875_p5 = pnand %p874_p0, %p868_p11 }
  0x5a   : > { %663 = vmatprep.subr.mxu1 %v958_v6 }
  0x5b   : > { %664 = vmatpush3.msra.mxu1 %v395_v14 }
  0x5c   : > { %665 = vmatprep.subr.mxu1 %v958_v6 }
  0x5d   : > { %666 = vmatpush3.msra.mxu1 %v394_v15 }
  0x5e   : > { %667 = vmatprep.subr.mxu1 %v958_v6 }
  0x5f   : > { %668 = vmatpush3.msra.mxu1 %v393_v16 }
  0x60   : > { %669 = vmatprep.subr.mxu1 %v958_v6 }
  0x61   : > { %670 = vmatpush3.msra.mxu1 %v392_v17 }
  0x62   : > { %671 = vmatprep.subr.mxu1 %v958_v6 }
  0x63   : > { %672 = vmatpush3.msra.mxu1 %v391_v18 }
  0x64   : > { %673 = vmatprep.subr.mxu1 %v958_v6 }
  0x65   : > { %674 = vmatpush3.msra.mxu1 %v390_v19 }
  0x66   : > { %675 = vmatprep.subr.mxu1 %v958_v6 }
  0x67   : > { %676 = vmatpush3.msra.mxu1 %v389_v20 }
  0x68   : > { %677 = vmatprep.subr.mxu1 %v958_v6 }
  0x69   : > { %678 = vmatpush3.msra.mxu1 %v388_v21 }
  0x6a   : > { %679 = vmatprep.subr.mxu1 %v958_v6 }
  0x6b   : > { %680 = vmatpush3.msra.mxu1 %v387_v22 }
  0x6c   : > { %681 = vmatprep.subr.mxu1 %v958_v6 }
  0x6d   : > { %682 = vmatpush3.msra.mxu1 %v386_v36 }
  0x6e   : > { %683 = vmatprep.subr.mxu1 %v958_v6 }
  0x6f   : > { %684 = vmatpush3.msra.mxu1 %v385_v37 }
  0xd8   : > { %v289_v27 = vpop.xlane.xlu0 %288 }
  0xd9   : > { %v292_v29 = vmul.f32 0.00390625, %v289_v27 }
  0xdb   : > { %v303_v33 = vrot.slane %v292_v29, %v302_v28 }
  0xdc   : > { %v291_v31 = vpop.xlane.xlu0 %290 }
  0xdd   : > { %v293_v32 = vmul.f32 0.00390625, %v291_v31 }
  0xdf   : > { %v308_v34 = vrot.slane %v293_v32, %v307_v30 }
  0xe1   : > { %v310_v35 = vsel %vm309_vm1, %v308_v34, %v303_v33 }
  0xe2   : > { %651 = vmatmul.mubr.msk.f32.vlgmr.msra.gmra.mxu0 %vm311_vm2, %v310_v35 }
 0x1a2   : > { %v380_v38 = vpop.f32.mrf.mxu0 }
 0x1a3   : > { %v384_v39 = vmax.f32 %v380_v38, 0.0 }
 0x1a4   : > { %v652_v40 = vpop.f32.mrf.mxu0 }
 0x1a5   : > { %686 = vmatmul.mubr.f32.vlgmr.msra.gmra.mxu1 %v384_v39 }
 0x265   : > { %v468_v42 = vpop.f32.mrf.mxu1 }
 0x266   : > { %v469_v43 = vadd.f32 %v468_v42, %v401_v41 }
 0x267   : > { %v687_v44 = vpop.f32.mrf.mxu1 }
 0x268   : > { %v472_v46 = vmul.f32 0.029411765, %v469_v43  ;;  %v621_v55 = vmul.f32 -0.029411765, %v469_v43 }
 0x26a   : > { %v482_v47 = vsel %vm1143_vm5, %v472_v46, -inf  ;;  %v474_v56 = vmul.f32 1.442695, %v621_v55 }
 0x26b   : > { %v484_v48 = vsel %vm483_vm6, %v482_v47, -inf }
 0x26c   : > { %485 = vmax.xlane.f32.xlu1 %v484_v48 }
 0x2f5   : > { %v486_v49 = vpop.xlane.xlu1 %485 }
 0x2f6   : > { %v487_v50 = vsub.f32 %v482_v47, %v486_v49 }
 0x2f8   : > { %v488_v51 = vmul.f32 1.442695, %v487_v50 }
 0x2fa   : > { %777 = vpow2.f32 %v488_v51 }
 0x2fb   : > { %779 = vpow2.f32 %v474_v56 }
 0x307   : > { %v778_v52 = vpop.eup %777 }
 0x308   : > { %v490_v53 = vsel %vm1143_vm5, %v778_v52, 0.0  ;;  %v780_v57 = vpop.eup %779 }
 0x309   : > { %v491_v54 = vsel %vm483_vm6, %v490_v53, 0.0  ;;  %v476_v58 = vadd.f32 1.0, %v780_v57 }
 0x30a   : > { %492 = vadd.xlane.f32.xlu1 %v491_v54 }
 0x393   : > { %v493_v59 = vpop.xlane.xlu1 %492 }
 0x394   : > { %781 = vrcp.f32 %v493_v59 }
 0x395   : > { %783 = vrcp.f32 %v476_v58 }
 0x3a1   : > { %v782_v60 = vpop.eup %781 }
 0x3a2   : > { %v495_v61 = vmul.f32 %v782_v60, %v490_v53  ;;  %v784_v62 = vpop.eup %783 }
 0x3a4   : > { %v496_v63 = vsel %vm1143_vm5, %v495_v61, %v784_v62 }
 0x3a5   : > { %497 = vst [vmem:[%s259_s10] sm:$0x1] %v496_v63 }
 0x3a6   : > { %878 = shalt.err (!%p875_p5)
}
 0x3a7   : > { %s879_s9 = scalar_lea.hbm %s1156_s22, 16  ;;  %s883_s14 = scalar_lea.hbm %s1204_s4, 32 }
 0x3a8   : > { %p880_p10 = scmp.ne.s32.totalorder %s1156_s22, %s879_s9  ;;  %p884_p6 = scmp.lt.s32.totalorder %s1156_s22, %s1204_s4 }
 0x3a9   : > { %p885_p12 = scmp.lt.s32.totalorder %s883_s14, %s879_s9 }
 0x3aa   : > { %p881_p1 = pnand %p880_p10, %p1081_p7 }
 0x3ab   : > { %p886_p3 = por %p885_p12, %p884_p6 }
 0x3ac   : > { %p882_p4 = pneg %p881_p1 }
 0x3ae   : > { %p887_p8 = pnand %p886_p3, %p882_p4 }
 0x3b0   : > { %890 = shalt.err (!%p887_p8)
}
 0x3b1   : > { %698 = dma.vmem_to_hbm [thread:$0]  (%p1081_p7), %s512_s12, 16, %s1156_s22, %s499_s29  }
 0x3b2 PF: > { %s523_s27 = sand.u32 1, %s929_s15   ;;  %p1220_p9 = scmp.ne.s32.totalorder %s1211_s26, 0 }
 0x3b3   : > { %p1221_p11 = scmp.ge.s32.totalorder %s949_s20, 2  ;;  %s524_s10 = scalar_lea.sflag [#allocation5], %s523_s27 }
 0x3b5   : > { %p712_p2 = pnand %p1221_p11, %p1220_p9 }
 0x3b7   : > { %p713_p13 = pneg %p712_p2 }
 0x3b9   : > { %924 = dma.done.wait (%p713_p13), %s524_s10, 16  }
 0x3ba   : > { %926 = vsyncadd (%p713_p13), %s524_s10, 4294967280  ;;  %s21_s20 = sadd.s32 1, %s949_s20   ;;  %s1222_s15 = smov %s933_s16 }
 0x3bb   : > { %p18_p0 = scmp.ge.s32.totalorder %s21_s20, 4   ;;  %s1223_s16 = smov %s937_s17 }
 0x3bc   : > { %s1224_s17 = smov %s1090_s7  ;;  %s1225_s18 = smov %s945_s19 }
 0x3bd   : > { %s1226_s19 = smov %s1228_s21  ;;  %20 = sbr.rel (!%p18_p0) target bundleno = 7 (0x7), region = 97 }
 0x3c2   :  { %528 = vsyncpa [#allocation4], 1 }
 0x3c3   :  { %530 = vsyncpa [#allocation4 + $0x1], 1 }
 0x3c4   :  { %531 = vsyncpa [#allocation7], 1 }
 0x3c5   :  { %532 = vsyncpa [#allocation5], 1 }
 0x3c6   :  { %534 = vsyncpa [#allocation5 + $0x1], 1 }

</bundles_post_ra>
